<compile_context>
chip_gen: v7x
topology: tpu7x:2x2x1
jax: 0.10.0
libtpu: 0.0.40
codegen_flags: <defaults>
</compile_context>

<pallas_src>
import functools

import jax
import jax.numpy as jnp
from jax.experimental import pallas as pl
from jax.experimental.pallas import tpu as pltpu


# ---------------------------------------------------------------------------
# Kernels
# ---------------------------------------------------------------------------

def _mlp2_kernel(hid_relu, out_relu,
                 x_ref, w1_ref, b1_ref, w2_ref, b2_ref, o_ref):
    x = x_ref[...]
    w1 = w1_ref[...]
    if x.dtype != w1.dtype:
        # In-VMEM cast (hidden under DMA); x stays f32 in HBM.
        x = x.astype(w1.dtype)
    h = jnp.dot(x, w1, preferred_element_type=jnp.float32)
    h = h + b1_ref[...]
    if hid_relu:
        h = jnp.maximum(h, 0.0)
    # Keep h in f32 for the second contraction; upcast bf16 weights in VMEM.
    w2 = w2_ref[...].astype(jnp.float32)
    o = jnp.dot(h, w2, preferred_element_type=jnp.float32)
    o = o + b2_ref[...]
    if out_relu:
        o = jnp.maximum(o, 0.0)
    o_ref[...] = o.astype(o_ref.dtype)


def _linear_kernel(x_ref, w_ref, b_ref, o_ref):
    x = x_ref[...]
    w = w_ref[...]
    if x.dtype != w.dtype:
        x = x.astype(w.dtype)
    o = jnp.dot(x, w, preferred_element_type=jnp.float32)
    o_ref[...] = (o + b_ref[...]).astype(o_ref.dtype)


# ---------------------------------------------------------------------------
# Parameter prep (run once at init, not in the forward path)
# ---------------------------------------------------------------------------

def prepare_params(params, *, nonlinear, hid_relu, out_relu,
                   mxu_dtype=jnp.float32, collapse_linear=True):
    """Hoisted, one-time parameter preparation.

    - Optionally collapses two activation-free linears into one (W = W1@W2,
      b = b1@W2 + b2).  Flag-gated: changes float association (~1e-4).
    - Casts weights to `mxu_dtype` (bf16 halves weight/x-operand bytes on the
      MXU path); biases stay f32 and are reshaped to (1, out) for broadcast.
    Returns (prepared_params, effective_nonlinear).
    """
    if nonlinear and collapse_linear and not hid_relu and not out_relu:
        hi = jax.lax.Precision.HIGHEST
        w = jnp.dot(params["w1"], params["w2"], precision=hi)
        b = jnp.dot(params["b1"], params["w2"], precision=hi) + params["b2"]
        params = {"w1": w, "b1": b}
        nonlinear = False

    if nonlinear:
        prepped = {
            "w1": params["w1"].astype(mxu_dtype),
            "b1": params["b1"].reshape(1, -1).astype(jnp.float32),
            "w2": params["w2"].astype(mxu_dtype),
            "b2": params["b2"].reshape(1, -1).astype(jnp.float32),
        }
    else:
        prepped = {
            "w1": params["w1"].astype(mxu_dtype),
            "b1": params["b1"].reshape(1, -1).astype(jnp.float32),
        }
    return prepped, nonlinear


# ---------------------------------------------------------------------------
# Wrapper
# ---------------------------------------------------------------------------

def _round_up(v, m):
    return ((v + m - 1) // m) * m


def _choose_tb(B, block_b, row_align=8):
    """Batch tile size: <= block_b rows, multiple of row_align when tiling,
    and >=2 grid steps whenever there is enough work (v7x has 2 TensorCores)."""
    if B <= row_align:
        return B
    steps = max(pl.cdiv(B, block_b), 2 if B >= 2 * row_align else 1)
    tb = _round_up(pl.cdiv(B, steps), row_align)
    return min(tb, B)


def _vmem_limit_bytes(TB, N, k, M, in_item, w_item, out_item):
    x_b = 2 * TB * N * in_item            # double-buffered input tile
    o_b = 2 * TB * M * out_item           # double-buffered output tile
    w_b = N * k * w_item + k * 4 + k * M * w_item + M * 4
    scratch = TB * (k + M) * 4            # f32 intermediates (h, o)
    need = x_b + o_b + w_b + 2 * scratch
    # Headroom, clamped to stay inside v5e's scoped default floor and v7x's
    # 64 MiB physical VMEM.
    return int(min(max(2 * need, 16 << 20), 48 << 20))


def mlp_projection(x, prepped, *, nonlinear, hid_relu, out_relu,
                   block_b=2048, out_dtype=None):
    """Forward pass of MLPProjection on pre-prepared params (see prepare_params).

    x: (..., N) float32 (leading dims flattened to the batch axis).
    prepped (nonlinear=True):  w1:(N,k) b1:(1,k) w2:(k,M) b2:(1,M)
    prepped (nonlinear=False): w1:(N,M) b1:(1,M)
    """
    lead = x.shape[:-1]
    N = x.shape[-1]
    x2d = x.reshape(-1, N)
    B = x2d.shape[0]
    out_dtype = x.dtype if out_dtype is None else out_dtype

    TB = _choose_tb(B, block_b)
    grid = (pl.cdiv(B, TB),)
    cparams_kwargs = dict(dimension_semantics=("parallel",))

    in_item = jnp.dtype(x2d.dtype).itemsize
    w_item = jnp.dtype(prepped["w1"].dtype).itemsize
    out_item = jnp.dtype(out_dtype).itemsize

    if nonlinear:
        w1, b1, w2, b2 = prepped["w1"], prepped["b1"], prepped["w2"], prepped["b2"]
        k = w1.shape[1]
        M = w2.shape[1]
        cparams = pltpu.CompilerParams(
            vmem_limit_bytes=_vmem_limit_bytes(TB, N, k, M, in_item, w_item,
                                               out_item),
            **cparams_kwargs)
        kernel = functools.partial(_mlp2_kernel, hid_relu, out_relu)
        out = pl.pallas_call(
            kernel,
            out_shape=jax.ShapeDtypeStruct((B, M), out_dtype),
            grid=grid,
            in_specs=[
                pl.BlockSpec((TB, N), lambda i: (i, 0)),   # x: tiled over B
                pl.BlockSpec((N, k), lambda i: (0, 0)),    # weights pinned
                pl.BlockSpec((1, k), lambda i: (0, 0)),
                pl.BlockSpec((k, M), lambda i: (0, 0)),
                pl.BlockSpec((1, M), lambda i: (0, 0)),
            ],
            out_specs=pl.BlockSpec((TB, M), lambda i: (i, 0)),
            compiler_params=cparams,
        )(x2d, w1, b1, w2, b2)
    else:
        w1, b1 = prepped["w1"], prepped["b1"]
        M = w1.shape[1]
        cparams = pltpu.CompilerParams(
            vmem_limit_bytes=_vmem_limit_bytes(TB, N, 0, M, in_item, w_item,
                                               out_item),
            **cparams_kwargs)
        out = pl.pallas_call(
            _linear_kernel,
            out_shape=jax.ShapeDtypeStruct((B, M), out_dtype),
            grid=grid,
            in_specs=[
                pl.BlockSpec((TB, N), lambda i: (i, 0)),
                pl.BlockSpec((N, M), lambda i: (0, 0)),
                pl.BlockSpec((1, M), lambda i: (0, 0)),
            ],
            out_specs=pl.BlockSpec((TB, M), lambda i: (i, 0)),
            compiler_params=cparams,
        )(x2d, w1, b1)

    return out.reshape(*lead, M)


# ---------------------------------------------------------------------------
# Init + reference (pure JAX)
# ---------------------------------------------------------------------------

def init_params(key, N, M, k, codebook_size, nonlinear):
    """Deterministic init mimicking nn.Linear's uniform(-1/sqrt(fan_in), ...)."""
    if nonlinear:
        if codebook_size < k:
            k = codebook_size
        k1, k2, k3, k4 = jax.random.split(key, 4)
        lim1 = 1.0 / jnp.sqrt(N)
        lim2 = 1.0 / jnp.sqrt(k)
        return {
            # stored transposed relative to torch (out, in) -> (in, out)
            "w1": jax.random.uniform(k1, (N, k), jnp.float32, -lim1, lim1),
            "b1": jax.random.uniform(k2, (k,), jnp.float32, -lim1, lim1),
            "w2": jax.random.uniform(k3, (k, M), jnp.float32, -lim2, lim2),
            "b2": jax.random.uniform(k4, (M,), jnp.float32, -lim2, lim2),
        }
    k1, k2 = jax.random.split(key, 2)
    lim = 1.0 / jnp.sqrt(N)
    return {
        "w1": jax.random.uniform(k1, (N, M), jnp.float32, -lim, lim),
        "b1": jax.random.uniform(k2, (M,), jnp.float32, -lim, lim),
    }


def reference(x, params, *, nonlinear, hid_relu, out_relu):
    if nonlinear:
        h = x @ params["w1"] + params["b1"]
        if hid_relu:
            h = jnp.maximum(h, 0.0)
        o = h @ params["w2"] + params["b2"]
        if out_relu:
            o = jnp.maximum(o, 0.0)
        return o
    return x @ params["w1"] + params["b1"]


# ---------------------------------------------------------------------------
# Demo / self-test
# ---------------------------------------------------------------------------

if __name__ == "__main__":
    # Module config: MLPProjection(N=32, M=32, k=16, codebook_size=64,
    #                              nonlinear=True, hid_relu=True, out_relu=False)
    N, M, k_feat, codebook = 32, 32, 16, 64
    nonlinear, hid_relu, out_relu = True, True, False

    root = jax.random.PRNGKey(0)
    kx, kp, kx2 = jax.random.split(root, 3)

    B = 8
    x = jax.random.normal(kx, (B, N), jnp.float32)
    params = init_params(kp, N, M, k_feat, codebook, nonlinear)
    ref = reference(x, params, nonlinear=nonlinear,
                    hid_relu=hid_relu, out_relu=out_relu)

    # (1) Exact f32 MXU path (module semantics).
    prep_f32, nl_f32 = prepare_params(params, nonlinear=nonlinear,
                                      hid_relu=hid_relu, out_relu=out_relu,
                                      mxu_dtype=jnp.float32)
    out = mlp_projection(x, prep_f32, nonlinear=nl_f32, hid_relu=hid_relu,
                         out_relu=out_relu)
    out = jax.block_until_ready(out)
    assert out.shape == (B, M)
    assert jnp.allclose(out, ref, atol=1e-5, rtol=1e-5)

    # (2) bf16 weight fast path: x stays f32 in HBM, cast in-kernel; h stays
    #     f32 for the second contraction.
    prep_bf, nl_bf = prepare_params(params, nonlinear=nonlinear,
                                    hid_relu=hid_relu, out_relu=out_relu,
                                    mxu_dtype=jnp.bfloat16)
    out_bf = mlp_projection(x, prep_bf, nonlinear=nl_bf, hid_relu=hid_relu,
                            out_relu=out_relu)
    out_bf = jax.block_until_ready(out_bf)
    assert out_bf.shape == (B, M)
    assert jnp.allclose(out_bf, ref, atol=5e-2, rtol=5e-2)

    # (3) Large-batch tiled path: multiple grid steps, pinned VMEM weights.
    B2 = 1024
    x2 = jax.random.normal(kx2, (B2, N), jnp.float32)
    out2 = mlp_projection(x2, prep_f32, nonlinear=nl_f32, hid_relu=hid_relu,
                          out_relu=out_relu, block_b=256)
    out2 = jax.block_until_ready(out2)
    ref2 = reference(x2, params, nonlinear=nonlinear,
                     hid_relu=hid_relu, out_relu=out_relu)
    assert out2.shape == (B2, M)
    assert jnp.allclose(out2, ref2, atol=1e-5, rtol=1e-5)

    # (4) nonlinear=True but no ReLUs -> flag-gated algebraic collapse.
    prep_c, nl_c = prepare_params(params, nonlinear=True, hid_relu=False,
                                  out_relu=False, mxu_dtype=jnp.float32,
                                  collapse_linear=True)
    out3 = mlp_projection(x, prep_c, nonlinear=nl_c, hid_relu=False,
                          out_relu=False)
    out3 = jax.block_until_ready(out3)
    ref3 = reference(x, params, nonlinear=True, hid_relu=False, out_relu=False)
    assert jnp.allclose(out3, ref3, atol=1e-4, rtol=1e-4)

    # (5) nonlinear=False single-linear path, with a 3-D input (leading dims
    #     flattened like nn.Linear).
    params_lin = init_params(kp, N, M, k_feat, codebook, False)
    prep_lin, nl_lin = prepare_params(params_lin, nonlinear=False,
                                      hid_relu=False, out_relu=False)
    x3 = jax.random.normal(kx, (2, 4, N), jnp.float32)
    out4 = mlp_projection(x3, prep_lin, nonlinear=nl_lin, hid_relu=False,
                          out_relu=False)
    out4 = jax.block_until_ready(out4)
    ref4 = reference(x3, params_lin, nonlinear=False,
                     hid_relu=False, out_relu=False)
    assert out4.shape == (2, 4, M)
    assert jnp.allclose(out4, ref4, atol=1e-5, rtol=1e-5)

    print("KERNEL_OK")
</pallas_src>

<mosaic_0001>
module attributes {stable_mosaic.version = 11 : i64} {
  func.func @_mlp2_kernel(%arg0: i32, %arg1: memref<8x32xf32, #tpu.memory_space<vmem>>, %arg2: memref<32x16xf32, #tpu.memory_space<vmem>>, %arg3: memref<1x16xf32, #tpu.memory_space<vmem>>, %arg4: memref<16x32xf32, #tpu.memory_space<vmem>>, %arg5: memref<1x32xf32, #tpu.memory_space<vmem>>, %arg6: memref<8x32xf32, #tpu.memory_space<vmem>>) attributes {dimension_semantics = [#tpu.dimension_semantics<parallel>], iteration_bounds = array<i64: 1>, scalar_prefetch = 0 : i64, scratch_operands = 0 : i64, tpu.core_type = #tpu.core_type<tc>, window_params = [{transform_indices = @transform_0, window_bounds = array<i64: 8, 32>}, {pipeline_mode = #tpu.pipeline_mode<synchronous>, transform_indices = @transform_1, window_bounds = array<i64: 32, 16>}, {pipeline_mode = #tpu.pipeline_mode<synchronous>, transform_indices = @transform_2, window_bounds = array<i64: 1, 16>}, {pipeline_mode = #tpu.pipeline_mode<synchronous>, transform_indices = @transform_3, window_bounds = array<i64: 16, 32>}, {pipeline_mode = #tpu.pipeline_mode<synchronous>, transform_indices = @transform_4, window_bounds = array<i64: 1, 32>}, {transform_indices = @transform_5, window_bounds = array<i64: 8, 32>}]} {
    %c0 = arith.constant 0 : index
    %c0_0 = arith.constant 0 : index
    %0 = vector.load %arg1[%c0, %c0_0] : memref<8x32xf32, #tpu.memory_space<vmem>>, vector<8x32xf32>
    %c0_1 = arith.constant 0 : index
    %c0_2 = arith.constant 0 : index
    %1 = vector.load %arg2[%c0_1, %c0_2] : memref<32x16xf32, #tpu.memory_space<vmem>>, vector<32x16xf32>
    %cst = arith.constant dense<0.000000e+00> : vector<8x16xf32>
    %2 = tpu.matmul %0, %1, %cst {dimension_numbers = #tpu.dot_dimension_numbers<[1], [0], [0], [1], [0, 0, 1, 1], [], []>} : vector<8x32xf32>, vector<32x16xf32>, vector<8x16xf32> -> vector<8x16xf32>
    %c0_3 = arith.constant 0 : index
    %c0_4 = arith.constant 0 : index
    %3 = vector.load %arg3[%c0_3, %c0_4] : memref<1x16xf32, #tpu.memory_space<vmem>>, vector<1x16xf32>
    %4 = vector.broadcast %3 : vector<1x16xf32> to vector<8x16xf32>
    %5 = arith.addf %2, %4 : vector<8x16xf32>
    %cst_5 = arith.constant 0.000000e+00 : f32
    %6 = vector.broadcast %cst_5 : f32 to vector<8x16xf32>
    %7 = arith.maximumf %5, %6 : vector<8x16xf32>
    %c0_6 = arith.constant 0 : index
    %c0_7 = arith.constant 0 : index
    %8 = vector.load %arg4[%c0_6, %c0_7] : memref<16x32xf32, #tpu.memory_space<vmem>>, vector<16x32xf32>
    %cst_8 = arith.constant dense<0.000000e+00> : vector<8x32xf32>
    %9 = tpu.matmul %7, %8, %cst_8 {dimension_numbers = #tpu.dot_dimension_numbers<[1], [0], [0], [1], [0, 0, 1, 1], [], []>} : vector<8x16xf32>, vector<16x32xf32>, vector<8x32xf32> -> vector<8x32xf32>
    %c0_9 = arith.constant 0 : index
    %c0_10 = arith.constant 0 : index
    %10 = vector.load %arg5[%c0_9, %c0_10] : memref<1x32xf32, #tpu.memory_space<vmem>>, vector<1x32xf32>
    %11 = vector.broadcast %10 : vector<1x32xf32> to vector<8x32xf32>
    %12 = arith.addf %9, %11 : vector<8x32xf32>
    %c0_11 = arith.constant 0 : index
    %c0_12 = arith.constant 0 : index
    %13 = vector.load %arg6[%c0_11, %c0_12] : memref<8x32xf32, #tpu.memory_space<vmem>>, vector<8x32xf32>
    tpu.vector_store %arg6[%c0_11, %c0_12], %12 {strides = array<i32>} : memref<8x32xf32, #tpu.memory_space<vmem>>, vector<8x32xf32>,
    return
  }
  func.func @transform_0(%arg0: i32) -> (i32, i32) {
    %c0_i32 = arith.constant 0 : i32
    %c0_i32_0 = arith.constant 0 : i32
    return %arg0, %c0_i32 : i32, i32
  }
  func.func @transform_1(%arg0: i32) -> (i32, i32) {
    %c0_i32 = arith.constant 0 : i32
    %c0_i32_0 = arith.constant 0 : i32
    %c0_i32_1 = arith.constant 0 : i32
    return %c0_i32, %c0_i32_0 : i32, i32
  }
  func.func @transform_2(%arg0: i32) -> (i32, i32) {
    %c0_i32 = arith.constant 0 : i32
    %c0_i32_0 = arith.constant 0 : i32
    %c0_i32_1 = arith.constant 0 : i32
    return %c0_i32, %c0_i32_0 : i32, i32
  }
  func.func @transform_3(%arg0: i32) -> (i32, i32) {
    %c0_i32 = arith.constant 0 : i32
    %c0_i32_0 = arith.constant 0 : i32
    %c0_i32_1 = arith.constant 0 : i32
    return %c0_i32, %c0_i32_0 : i32, i32
  }
  func.func @transform_4(%arg0: i32) -> (i32, i32) {
    %c0_i32 = arith.constant 0 : i32
    %c0_i32_0 = arith.constant 0 : i32
    %c0_i32_1 = arith.constant 0 : i32
    return %c0_i32, %c0_i32_0 : i32, i32
  }
  func.func @transform_5(%arg0: i32) -> (i32, i32) {
    %c0_i32 = arith.constant 0 : i32
    %c0_i32_0 = arith.constant 0 : i32
    return %arg0, %c0_i32 : i32, i32
  }
}

</mosaic_0001>

<bundles_post_ra>
// kernel: tpu_custom_call.1
= control target key start
LH: loop header
LB: loop body
LE: loop exit
PB: predicated region body
PF: predicated region fallthrough
CT: control target
= control target key end

     0   :  { %v273_v3 = vmov 0.0|0.0   ;;  %vm274_vm0 = vmmov 0   ;;  %v275_v6 = vmov 0.0   ;;  %s348_s0 = inlined_call_operand.vmem [shape: f32[8,32], index: 0, kind: input, shape index: {}]   ;;  %s349_s1 = inlined_call_operand.vmem [shape: f32[32,16], index: 1, kind: input, shape index: {}]   ;;  %s350_s2 = inlined_call_operand.vmem [shape: f32[1,16], index: 2, kind: input, shape index: {}]   ;;  %s351_s3 = inlined_call_operand.vmem [shape: f32[16,32], index: 3, kind: input, shape index: {}]   ;;  %s352_s4 = inlined_call_operand.vmem [shape: f32[1,32], index: 4, kind: input, shape index: {}]   ;;  %s353_s5 = inlined_call_operand.hbm [shape: f32[8,32], index: 5, kind: output, shape index: {}]  }
   0x1   :  { %v22_v0 = vld [vmem:[%s349_s1] sm:$0xff]  ;;  %v23_v1 = vld [vmem:[%s349_s1 + $0x8] sm:$0xff]  ;;  %v24_v2 = vld [vmem:[%s349_s1 + $0x10] sm:$0xff]  ;;  %236 = vmatprep.subr.bf16.mxu0 %v273_v3  ;;  %226 = vmatprep.mubr.msk.f32.mxu0 %vm274_vm0, %v275_v6 }
   0x2   :  { %v237_v4 = vpack.c.bf16 %v23_v1, %v22_v0  ;;  %v25_v5 = vld [vmem:[%s349_s1 + $0x18] sm:$0xff]  ;;  %242 = vmatprep.subr.bf16.mxu1 %v273_v3  ;;  %233 = vmatprep.mubr.msk.f32.mxu1 %vm274_vm0, %v275_v6 }
   0x3   :  { %10 = vsyncpa [#allocation3], 0  ;;  %v240_v7 = vpack.c.bf16 %v25_v5, %v24_v2  ;;  %v21_v8 = vld [vmem:[%s348_s0] sm:$0xff]  ;;  %vm33_vm1 = vcmask 261120   ;;  %v109_v10 = vld [vmem:[%s351_s3 + $0x8] sm:$0xff]  ;;  %vm117_vm2 = vcmask 130048  }
   0x4   :  { %238 = vmatpush3.bf16.msra.mxu0 %v237_v4  ;;  %v108_v9 = vld [vmem:[%s351_s3] sm:$0xff]  ;;  %s276_s9 = smov [#allocation2]  }
   0x5   :  { %239 = vmatprep.subr.bf16.mxu0 %v273_v3  ;;  %v243_v11 = vpack.c.bf16 %v109_v10, %v108_v9  ;;  %v206_v12 = vld [vmem:[%s350_s2] ss:$0 sm:$0xff]  ;;  %s198_s10 = sshll.u32 %s276_s9, 4  ;;  %s199_s10 = int_to_ptr.vmem [resolvable:$true] %s198_s10 }
   0x6   :  { %v208_v17 = vld [vmem:[%s352_s4] ss:$0 sm:$0xff]  ;;  %s249_s3 = scalar_lea.vmem %s199_s10, 128  ;;  %p254_p1 = scmp.lt.s32.totalorder %s199_s10, %s199_s10 }
   0x7   :  { %244 = vmatpush3.bf16.msra.mxu1 %v243_v11  ;;  %p250_p0 = scmp.ne.s32.totalorder %s199_s10, %s249_s3  ;;  %p255_p2 = scmp.lt.s32.totalorder %s249_s3, %s249_s3 }
   0x8   :  { %241 = vmatpush3.bf16.msra.mxu0 %v240_v7 }
   0x9   :  { %p256_p3 = por %p255_p2, %p254_p1 }
   0xb   :  { %227 = vmatmul.mubr.msk.f32.vlgmr.msra.gmra.mrb[0].mxu0 %vm33_vm1, %v21_v8  ;;  %p257_p4 = pnand %p256_p3, %p250_p0 }
  0xde   :  { %v103_v13 = vpop.f32.mrb[0].mxu0 }
  0xdf   :  { %v104_v14 = vadd.f32 %v206_v12, %v103_v13  ;;  %v228_v15 = vpop.f32.mrb[1].mxu0 }
  0xe1   :  { %v107_v16 = vmax.f32 %v104_v14, 0.0 }
  0xe3   :  { %234 = vmatmul.mubr.msk.f32.vlgmr.msra.gmra.mrb[0].mxu1 %vm117_vm2, %v107_v16 }
 0x1b6   :  { %v187_v18 = vpop.f32.mrb[0].mxu1 }
 0x1b7   :  { %v188_v19 = vadd.f32 %v208_v17, %v187_v18  ;;  %v235_v20 = vpop.f32.mrb[1].mxu1 }
 0x1b9   :  { %191 = vst.msk [vmem:[#allocation2] sm:$0xff] %vm33_vm1, %v188_v19 }
 0x1ba   :  { %260 = shalt.err (!%p257_p4)
}
 0x1bb   :  { %s261_s12 = scalar_lea.hbm %s353_s5, 128 }
 0x1bc   :  { %p262_p5 = scmp.ne.s32.totalorder %s353_s5, %s261_s12  ;;  %p265_p6 = scmp.lt.u32.totalorder %s261_s12, %s353_s5 }
 0x1be   :  { %p267_p7 = pnand %p265_p6, %p262_p5 }
 0x1c0   :  { %270 = shalt.err (!%p267_p7)
}
 0x1c1   :  { %201 = dma.vmem_to_hbm [thread:$0]  %s199_s10, 128, %s353_s5, [#allocation3]  }
 0x1c2   :  { %271 = dma.done.wait [#allocation3], 128  }
 0x1c3   :  { %272 = vsyncadd [#allocation3], 4294967168 }
 0x1c4   :  { %205 = vsyncpa [#allocation3], 1 }

</bundles_post_ra>
